<compile_context>
chip_gen: v5e
topology: v5e:2x2
jax: 0.10.0
libtpu: 0.0.40
codegen_flags: <defaults>
</compile_context>

<pallas_src>
import functools

import jax
import jax.numpy as jnp
from jax.experimental import pallas as pl
from jax.experimental.pallas import tpu as pltpu

TOK_TILE = 256                               # tokens per grid step (sublane- and lane-friendly)
_FAST_PATH_TABLE_BYTES = 8 * 1024 * 1024     # tables <= this take the VMEM-resident path
_VMEM_LIMIT_BYTES = 32 * 1024 * 1024         # safe scoped limit on v5e/v6e (128 MiB) and v7x (64 MiB)


def _embed_onehot_kernel(tok_ref, w_ref, out_ref):
    # tok_ref: VMEM (TOK_TILE, 1) int32   -- this tile's token ids
    # w_ref  : VMEM (V, D)                -- full table, resident across the grid
    # out_ref: VMEM (TOK_TILE, D)
    ids = tok_ref[...]                                                  # (T, 1)
    v = w_ref.shape[0]
    onehot = (jax.lax.broadcasted_iota(jnp.int32, (ids.shape[0], v), 1)
              == ids).astype(w_ref.dtype)                               # (T, V)
    out_ref[...] = jnp.dot(
        onehot, w_ref[...], preferred_element_type=jnp.float32
    ).astype(out_ref.dtype)


def _embed_gather_kernel(ids_ref, w_hbm, out_ref, sem):
    # ids_ref: SMEM (num_tiles, TOK_TILE) int32 -- scalar-prefetched token ids
    # w_hbm  : HBM  (V, D)                      -- embedding table, never copied whole
    # out_ref: VMEM (TOK_TILE, D)               -- pipelined output block (DMA'd into directly)
    # sem    : DMA semaphore                    -- all row copies accumulate on it
    g = pl.program_id(0)

    # Issue every row gather back-to-back; unrolled so SMEM id loads, address
    # math and dma.start co-issue across iterations.  Rows land straight in
    # the pipelined output block (no staging buffer / VMEM->VMEM copy).
    def _issue(j, carry):
        tok = ids_ref[g, j]
        pltpu.make_async_copy(
            w_hbm.at[pl.ds(tok, 1), :],
            out_ref.at[pl.ds(j, 1), :],
            sem,
        ).start()
        return carry

    jax.lax.fori_loop(0, TOK_TILE, _issue, None, unroll=8)

    # Single aggregate wait: DMA semaphores count bytes, so one descriptor
    # shaped like the whole (TOK_TILE, D) tile drains all TOK_TILE identical
    # (1, D) row copies at once.  Requires V >= TOK_TILE (guaranteed by the
    # dispatcher) and that every issued copy has the same shape/dtype.
    pltpu.make_async_copy(
        w_hbm.at[pl.ds(0, TOK_TILE), :],
        out_ref,
        sem,
    ).wait()

    # TODO(synk): optional cross-step double-buffering (issue tile g+1's rows
    # before draining tile g) would hide the HBM round trip at small D.
    # TODO(synk): for bf16 / narrow-D tables on v5e, gather two rows per
    # descriptor so each transfer is >= 512 B.


@functools.partial(jax.jit, static_argnames=("force_path",))
def embed(tokens, w_e, force_path=None):
    """Pallas embedding lookup: returns W_E[tokens] (PyTorch Embed.forward)."""
    b, s = tokens.shape
    v, d = w_e.shape
    n = b * s
    n_pad = pl.cdiv(n, TOK_TILE) * TOK_TILE
    num_tiles = n_pad // TOK_TILE

    flat = tokens.reshape(n).astype(jnp.int32)
    # PyTorch raises on out-of-range ids; we clamp so every gather stays in
    # bounds (documented semantic difference).
    flat = jnp.clip(flat, 0, v - 1)
    flat = jnp.pad(flat, (0, n_pad - n))        # padded ids read row 0; rows dropped below

    table_bytes = v * d * jnp.dtype(w_e.dtype).itemsize
    if force_path is None:
        use_fast = (table_bytes <= _FAST_PATH_TABLE_BYTES) or (v < TOK_TILE)
    else:
        use_fast = (force_path == "onehot")

    if use_fast:
        out_flat = pl.pallas_call(
            _embed_onehot_kernel,
            out_shape=jax.ShapeDtypeStruct((n_pad, d), w_e.dtype),
            grid=(num_tiles,),
            in_specs=[
                pl.BlockSpec((TOK_TILE, 1), lambda g: (g, 0)),   # this tile's ids
                pl.BlockSpec((v, d), lambda g: (0, 0)),          # whole table, VMEM-resident
            ],
            out_specs=pl.BlockSpec((TOK_TILE, d), lambda g: (g, 0)),
            compiler_params=pltpu.CompilerParams(
                dimension_semantics=("parallel",),
                vmem_limit_bytes=_VMEM_LIMIT_BYTES,
            ),
        )(flat.reshape(n_pad, 1), w_e)
    else:
        # HBM-resident gather path; the aggregate wait needs V >= TOK_TILE.
        assert v >= TOK_TILE, "gather path requires d_vocab >= TOK_TILE"
        # Ids are scalar-prefetched as a 2D (num_tiles, TOK_TILE) table: avoids
        # the 1D pow2 SMEM padding blow-up and removes the base+j add in the
        # hot issue loop.
        # TODO(synk): for extremely large batch*seq (>~256K tokens), block ids
        # into per-step SMEM tiles instead of prefetching the whole table.
        out_flat = pl.pallas_call(
            _embed_gather_kernel,
            out_shape=jax.ShapeDtypeStruct((n_pad, d), w_e.dtype),
            grid_spec=pltpu.PrefetchScalarGridSpec(
                num_scalar_prefetch=1,                     # token-id table -> SMEM
                grid=(num_tiles,),
                in_specs=[pl.BlockSpec(memory_space=pl.ANY)],   # table stays in HBM
                out_specs=pl.BlockSpec((TOK_TILE, d), lambda g, ids: (g, 0)),
                scratch_shapes=[pltpu.SemaphoreType.DMA],
            ),
            compiler_params=pltpu.CompilerParams(
                dimension_semantics=("parallel",),         # shard token tiles across TCs (v7x)
                vmem_limit_bytes=_VMEM_LIMIT_BYTES,
            ),
        )(flat.reshape(num_tiles, TOK_TILE), w_e)

    return out_flat[:n].reshape(b, s, d)


if __name__ == "__main__":
    # cfg: d_vocab=64, d_model=128, init_range=0.02; tokens: batch=2, seq=8
    d_vocab, d_model, init_range = 64, 128, 0.02
    batch, seq = 2, 8

    key = jax.random.PRNGKey(0)
    k_w, k_tok, k_w2, k_tok2 = jax.random.split(key, 4)

    # nn.init.normal_(W_E, std=init_range)
    w_e = jax.random.normal(k_w, (d_vocab, d_model), dtype=jnp.float32) * init_range
    tokens = jax.random.randint(k_tok, (batch, seq), 0, d_vocab, dtype=jnp.int32)

    out = jax.block_until_ready(embed(tokens, w_e))
    ref = w_e[tokens]
    assert out.shape == (batch, seq, d_model), out.shape
    assert jnp.allclose(out, ref, atol=1e-6, rtol=1e-6), "fast-path mismatch vs reference"

    # Also exercise the HBM-gather path (the large-vocab configuration).
    v2, d2 = 2048, 256
    w_e2 = jax.random.normal(k_w2, (v2, d2), dtype=jnp.float32) * init_range
    tokens2 = jax.random.randint(k_tok2, (batch, seq), 0, v2, dtype=jnp.int32)
    out2 = jax.block_until_ready(embed(tokens2, w_e2, force_path="gather"))
    ref2 = w_e2[tokens2]
    assert jnp.allclose(out2, ref2, atol=1e-6, rtol=1e-6), "gather-path mismatch vs reference"

    print("KERNEL_OK")
</pallas_src>

<mosaic_0001>
module attributes {stable_mosaic.version = 11 : i64} {
  func.func @_embed_onehot_kernel(%arg0: i32, %arg1: memref<256x1xi32, #tpu.memory_space<vmem>>, %arg2: memref<64x128xf32, #tpu.memory_space<vmem>>, %arg3: memref<256x128xf32, #tpu.memory_space<vmem>>) attributes {dimension_semantics = [#tpu.dimension_semantics<parallel>], iteration_bounds = array<i64: 1>, scalar_prefetch = 0 : i64, scratch_operands = 0 : i64, tpu.core_type = #tpu.core_type<tc>, window_params = [{transform_indices = @transform_0, window_bounds = array<i64: 256, 1>}, {pipeline_mode = #tpu.pipeline_mode<synchronous>, transform_indices = @transform_1, window_bounds = array<i64: 64, 128>}, {transform_indices = @transform_2, window_bounds = array<i64: 256, 128>}]} {
    %c0 = arith.constant 0 : index
    %c0_0 = arith.constant 0 : index
    %0 = vector.load %arg1[%c0, %c0_0] : memref<256x1xi32, #tpu.memory_space<vmem>>, vector<256x1xi32>
    %1 = tpu.iota {dimensions = array<i32: 1>} : vector<256x64xi32>
    %2 = vector.broadcast %0 : vector<256x1xi32> to vector<256x64xi32>
    %3 = arith.cmpi eq, %1, %2 : vector<256x64xi32>
    %4 = arith.extui %3 : vector<256x64xi1> to vector<256x64xi32>
    %5 = arith.sitofp %4 : vector<256x64xi32> to vector<256x64xf32>
    %c0_1 = arith.constant 0 : index
    %c0_2 = arith.constant 0 : index
    %6 = vector.load %arg2[%c0_1, %c0_2] : memref<64x128xf32, #tpu.memory_space<vmem>>, vector<64x128xf32>
    %cst = arith.constant dense<0.000000e+00> : vector<256x128xf32>
    %7 = tpu.matmul %5, %6, %cst {dimension_numbers = #tpu.dot_dimension_numbers<[1], [0], [0], [1], [0, 0, 1, 1], [], []>} : vector<256x64xf32>, vector<64x128xf32>, vector<256x128xf32> -> vector<256x128xf32>
    %c0_3 = arith.constant 0 : index
    %c0_4 = arith.constant 0 : index
    %8 = vector.load %arg3[%c0_3, %c0_4] : memref<256x128xf32, #tpu.memory_space<vmem>>, vector<256x128xf32>
    tpu.vector_store %arg3[%c0_3, %c0_4], %7 {strides = array<i32>} : memref<256x128xf32, #tpu.memory_space<vmem>>, vector<256x128xf32>,
    return
  }
  func.func @transform_0(%arg0: i32) -> (i32, i32) {
    %c0_i32 = arith.constant 0 : i32
    %c0_i32_0 = arith.constant 0 : i32
    return %arg0, %c0_i32 : i32, i32
  }
  func.func @transform_1(%arg0: i32) -> (i32, i32) {
    %c0_i32 = arith.constant 0 : i32
    %c0_i32_0 = arith.constant 0 : i32
    %c0_i32_1 = arith.constant 0 : i32
    return %c0_i32, %c0_i32_0 : i32, i32
  }
  func.func @transform_2(%arg0: i32) -> (i32, i32) {
    %c0_i32 = arith.constant 0 : i32
    %c0_i32_0 = arith.constant 0 : i32
    return %arg0, %c0_i32 : i32, i32
  }
}

</mosaic_0001>

<bundles_post_ra>
// kernel: embed.1
= control target key start
LH: loop header
LB: loop body
LE: loop exit
PB: predicated region body
PF: predicated region fallthrough
CT: control target
= control target key end

     0   :  { %v584_v0 = vmov 0   ;;  %v43_v43 = vlaneseq  ;;  %vm245_vm0 = vcmask 523264   ;;  %v585_v48 = vmov 0.0   ;;  %s915_s0 = inlined_call_operand.vmem [shape: s32[256,1], index: 0, kind: input, shape index: {}]   ;;  %s916_s1 = inlined_call_operand.vmem [shape: f32[64,128], index: 1, kind: input, shape index: {}]   ;;  %s917_s2 = inlined_call_operand.vmem [shape: f32[256,128], index: 2, kind: output, shape index: {}]  }
   0x1   :  { %583 = vset.pattern.permute.xlu2 %v584_v0  ;;  %582 = vset.pattern.permute.xlu1 %v584_v0  ;;  %v28_v1 = vld [vmem:[%s915_s0 + $0x88] sm:$0xff]  ;;  %v27_v2 = vld [vmem:[%s915_s0 + $0x80] sm:$0xff]  ;;  %v29_v7 = vld [vmem:[%s915_s0 + $0x90] sm:$0xff] }
   0x2   :  { %v11_v3 = vld [vmem:[%s915_s0] sm:$0xff]  ;;  %581 = vset.pattern.permute.xlu0 %v584_v0  ;;  %97 = vperm.xlu2 %583, %v28_v1   ;;  %v36_v4 = vld [vmem:[%s915_s0 + $0xc8] sm:$0xff]  ;;  %v21_v10 = vld [vmem:[%s915_s0 + $0x50] sm:$0xff]  ;;  %v721_v44 = vand.u32 127, %v43_v43 }
   0x3   :  { %94 = vperm.xlu0 %581, %v27_v2   ;;  %46 = vperm.xlu1 %582, %v11_v3   ;;  %v35_v5 = vld [vmem:[%s915_s0 + $0xc0] sm:$0xff]  ;;  %v12_v8 = vld [vmem:[%s915_s0 + $0x8] sm:$0xff]  ;;  %v37_v11 = vld [vmem:[%s915_s0 + $0xd0] sm:$0xff] }
   0x4   :  { %v19_v6 = vld [vmem:[%s915_s0 + $0x40] sm:$0xff]  ;;  %v20_v9 = vld [vmem:[%s915_s0 + $0x48] sm:$0xff]  ;;  %v13_v12 = vld [vmem:[%s915_s0 + $0x10] sm:$0xff] }
   0x5   :  { %v14_v13 = vld [vmem:[%s915_s0 + $0x18] sm:$0xff]  ;;  %v39_v16 = vld [vmem:[%s915_s0 + $0xe0] sm:$0xff]  ;;  %v32_v19 = vld [vmem:[%s915_s0 + $0xa8] sm:$0xff] }
   0x6   :  { %v30_v14 = vld [vmem:[%s915_s0 + $0x98] sm:$0xff]  ;;  %v31_v18 = vld [vmem:[%s915_s0 + $0xa0] sm:$0xff]  ;;  %v24_v22 = vld [vmem:[%s915_s0 + $0x68] sm:$0xff] }
   0x7   :  { %v38_v15 = vld [vmem:[%s915_s0 + $0xd8] sm:$0xff]  ;;  %v15_v20 = vld [vmem:[%s915_s0 + $0x20] sm:$0xff]  ;;  %v40_v23 = vld [vmem:[%s915_s0 + $0xe8] sm:$0xff] }
   0x8   :  { %v22_v17 = vld [vmem:[%s915_s0 + $0x58] sm:$0xff]  ;;  %v23_v21 = vld [vmem:[%s915_s0 + $0x60] sm:$0xff]  ;;  %v16_v24 = vld [vmem:[%s915_s0 + $0x28] sm:$0xff] }
   0x9   :  { %v17_v25 = vld [vmem:[%s915_s0 + $0x30] sm:$0xff]  ;;  %v244_v28 = vld [vmem:[%s916_s1 + $0x38] sm:$0xff]  ;;  %v242_v33 = vld [vmem:[%s916_s1 + $0x28] sm:$0xff] }
   0xa   :  { %121 = vperm.xlu2 %583, %v36_v4   ;;  %v33_v26 = vld [vmem:[%s915_s0 + $0xb0] sm:$0xff]  ;;  %v42_v30 = vld [vmem:[%s915_s0 + $0xf8] sm:$0xff]  ;;  %350 = vmatpush.msra.mxu0 %v244_v28  ;;  %v241_v34 = vld [vmem:[%s916_s1 + $0x20] sm:$0xff] }
   0xb   :  { %118 = vperm.xlu0 %581, %v35_v5   ;;  %70 = vperm.xlu1 %582, %v19_v6   ;;  %v41_v27 = vld [vmem:[%s915_s0 + $0xf0] sm:$0xff]  ;;  %v34_v32 = vld [vmem:[%s915_s0 + $0xb8] sm:$0xff]  ;;  %v238_v39 = vld [vmem:[%s916_s1 + $0x8] sm:$0xff] }
   0xc   :  { %v243_v29 = vld [vmem:[%s916_s1 + $0x30] sm:$0xff]  ;;  %556 = vmatpush.msra.mxu2 %v244_v28  ;;  %555 = vmatpush.msra.mxu1 %v244_v28  ;;  %v240_v35 = vld [vmem:[%s916_s1 + $0x18] sm:$0xff]  ;;  %v237_v40 = vld [vmem:[%s916_s1] sm:$0xff] }
   0xd   :  { %v25_v31 = vld [vmem:[%s915_s0 + $0x70] sm:$0xff]  ;;  %557 = vmatpush.msra.mxu3 %v244_v28  ;;  %351 = vmatpush.msra.mxu0 %v243_v29  ;;  %v18_v36 = vld [vmem:[%s915_s0 + $0x38] sm:$0xff] }
   0xe   :  { %559 = vmatpush.msra.mxu2 %v243_v29  ;;  %558 = vmatpush.msra.mxu1 %v243_v29  ;;  %v26_v37 = vld [vmem:[%s915_s0 + $0x78] sm:$0xff]  ;;  %v239_v38 = vld [vmem:[%s916_s1 + $0x10] sm:$0xff] }
   0xf   :  { %352 = vmatpush.msra.mxu0 %v242_v33  ;;  %560 = vmatpush.msra.mxu3 %v243_v29 }
  0x10   :  { %562 = vmatpush.msra.mxu2 %v242_v33  ;;  %561 = vmatpush.msra.mxu1 %v242_v33 }
  0x11   :  { %353 = vmatpush.msra.mxu0 %v241_v34  ;;  %563 = vmatpush.msra.mxu3 %v242_v33 }
  0x12   :  { %100 = vperm.xlu2 %583, %v29_v7   ;;  %565 = vmatpush.msra.mxu2 %v241_v34 }
  0x13   :  { %49 = vperm.xlu0 %581, %v12_v8   ;;  %73 = vperm.xlu1 %582, %v20_v9  }
  0x14   :  { %564 = vmatpush.msra.mxu1 %v241_v34  ;;  %354 = vmatpush.msra.mxu0 %v240_v35 }
  0x15   :  { %568 = vmatpush.msra.mxu2 %v240_v35  ;;  %566 = vmatpush.msra.mxu3 %v241_v34 }
  0x16   :  { %567 = vmatpush.msra.mxu1 %v240_v35  ;;  %355 = vmatpush.msra.mxu0 %v239_v38 }
  0x17   :  { %571 = vmatpush.msra.mxu2 %v239_v38  ;;  %569 = vmatpush.msra.mxu3 %v240_v35 }
  0x18   :  { %570 = vmatpush.msra.mxu1 %v239_v38  ;;  %356 = vmatpush.msra.mxu0 %v238_v39 }
  0x19   :  { %574 = vmatpush.msra.mxu2 %v238_v39  ;;  %572 = vmatpush.msra.mxu3 %v239_v38 }
  0x1a   :  { %76 = vperm.xlu2 %583, %v21_v10   ;;  %573 = vmatpush.msra.mxu1 %v238_v39 }
  0x1b   :  { %124 = vperm.xlu0 %581, %v37_v11   ;;  %52 = vperm.xlu1 %582, %v13_v12  }
  0x1c   :  { %357 = vmatpush.msra.mxu0 %v237_v40  ;;  %577 = vmatpush.msra.mxu2 %v237_v40 }
  0x1d   :  { %575 = vmatpush.msra.mxu3 %v238_v39  ;;  %576 = vmatpush.msra.mxu1 %v237_v40 }
  0x1f   :  { %578 = vmatpush.msra.mxu3 %v237_v40 }
  0x22   :  { %55 = vperm.xlu2 %583, %v14_v13  }
  0x23   :  { %103 = vperm.xlu0 %581, %v30_v14   ;;  %127 = vperm.xlu1 %582, %v38_v15  }
  0x2a   :  { %130 = vperm.xlu2 %583, %v39_v16  }
  0x2b   :  { %79 = vperm.xlu0 %581, %v22_v17   ;;  %106 = vperm.xlu1 %582, %v31_v18  }
  0x32   :  { %109 = vperm.xlu2 %583, %v32_v19  }
  0x33   :  { %58 = vperm.xlu0 %581, %v15_v20   ;;  %82 = vperm.xlu1 %582, %v23_v21  }
  0x3a   :  { %85 = vperm.xlu2 %583, %v24_v22  }
  0x3b   :  { %133 = vperm.xlu0 %581, %v40_v23   ;;  %61 = vperm.xlu1 %582, %v16_v24  }
  0x42   :  { %64 = vperm.xlu2 %583, %v17_v25  }
  0x43   :  { %112 = vperm.xlu0 %581, %v33_v26   ;;  %136 = vperm.xlu1 %582, %v41_v27  }
  0x4a   :  { %139 = vperm.xlu2 %583, %v42_v30  }
  0x4b   :  { %88 = vperm.xlu0 %581, %v25_v31   ;;  %115 = vperm.xlu1 %582, %v34_v32  }
  0x53   :  { %67 = vperm.xlu0 %581, %v18_v36   ;;  %91 = vperm.xlu1 %582, %v26_v37  }
  0x5c   :  { %v98_v41 = vpop.permute.xlu2 %97 }
  0x5d   :  { %vm158_vm3 = vcmp.eq.s32.totalorder %v721_v44, %v98_v41 }
  0x5e   :  { %v508_v54 = vsel %vm158_vm3, 1.0, %v585_v48 }
  0x64   :  { %v122_v42 = vpop.permute.xlu2 %121 }
  0x65   :  { %vm166_vm6 = vcmp.eq.s32.totalorder %v721_v44, %v122_v42 }
  0x66   :  { %v516_v61 = vsel %vm166_vm6, 1.0, %v585_v48 }
  0x6c   :  { %v101_v45 = vpop.permute.xlu2 %100 }
  0x6d   :  { %vm159_vm7 = vcmp.eq.s32.totalorder %v721_v44, %v101_v45 }
  0x6e   :  { %v509_v62 = vsel %vm159_vm7, 1.0, %v585_v48 }
  0x74   :  { %v77_v53 = vpop.permute.xlu2 %76 }
  0x75   :  { %v95_v46 = vpop.permute.xlu0 %94  ;;  %v47_v47 = vpop.permute.xlu1 %46  ;;  %vm151_vm10 = vcmp.eq.s32.totalorder %v721_v44, %v77_v53 }
  0x76   :  { %vm157_vm1 = vcmp.eq.s32.totalorder %v721_v44, %v95_v46  ;;  %vm141_vm2 = vcmp.eq.s32.totalorder %v721_v44, %v47_v47  ;;  %v501_v2 = vsel %vm151_vm10, 1.0, %v585_v48 }
  0x77   :  { %v507_v49 = vsel %vm157_vm1, 1.0, %v585_v48  ;;  %v491_v50 = vsel %vm141_vm2, 1.0, %v585_v48 }
  0x78   :  { %523 = vmatmul.msk.f32.vlgmr.msra.gmra.mxu0 %vm245_vm0, %v491_v50  ;;  %539 = vmatmul.msk.f32.vlgmr.msra.gmra.mxu2 %vm245_vm0, %v507_v49 }
  0x7c   :  { %v56_v63 = vpop.permute.xlu2 %55 }
  0x7d   :  { %v119_v51 = vpop.permute.xlu0 %118  ;;  %v71_v52 = vpop.permute.xlu1 %70  ;;  %vm144_vm13 = vcmp.eq.s32.totalorder %v721_v44, %v56_v63 }
  0x7e   :  { %vm165_vm4 = vcmp.eq.s32.totalorder %v721_v44, %v119_v51  ;;  %vm149_vm5 = vcmp.eq.s32.totalorder %v721_v44, %v71_v52  ;;  %v494_v8 = vsel %vm144_vm13, 1.0, %v585_v48 }
  0x7f   :  { %v515_v55 = vsel %vm165_vm4, 1.0, %v585_v48  ;;  %v499_v56 = vsel %vm149_vm5, 1.0, %v585_v48 }
  0x80   :  { %531 = vmatmul.msk.f32.vlgmr.msra.gmra.mxu1 %vm245_vm0, %v499_v56  ;;  %540 = vmatmul.msk.f32.gmra.mxu2 %vm245_vm0, %v508_v54 }
  0x81   :  { %547 = vmatmul.msk.f32.vlgmr.msra.gmra.mxu3 %vm245_vm0, %v515_v55 }
  0x84   :  { %v131_v5 = vpop.permute.xlu2 %130 }
  0x85   :  { %v50_v57 = vpop.permute.xlu0 %49  ;;  %v74_v58 = vpop.permute.xlu1 %73  ;;  %vm169_vm1 = vcmp.eq.s32.totalorder %v721_v44, %v131_v5 }
  0x86   :  { %vm142_vm8 = vcmp.eq.s32.totalorder %v721_v44, %v50_v57  ;;  %vm150_vm9 = vcmp.eq.s32.totalorder %v721_v44, %v74_v58  ;;  %v519_v16 = vsel %vm169_vm1, 1.0, %v585_v48 }
  0x87   :  { %v492_v59 = vsel %vm142_vm8, 1.0, %v585_v48  ;;  %v500_v60 = vsel %vm150_vm9, 1.0, %v585_v48 }
  0x88   :  { %524 = vmatmul.msk.f32.gmra.mxu0 %vm245_vm0, %v492_v59  ;;  %532 = vmatmul.msk.f32.gmra.mxu1 %vm245_vm0, %v500_v60 }
  0x89   :  { %541 = vmatmul.msk.f32.gmra.mxu2 %vm245_vm0, %v509_v62  ;;  %548 = vmatmul.msk.f32.gmra.mxu3 %vm245_vm0, %v516_v61 }
  0x8c   :  { %v110_v11 = vpop.permute.xlu2 %109 }
  0x8d   :  { %v125_v0 = vpop.permute.xlu0 %124  ;;  %v53_v1 = vpop.permute.xlu1 %52  ;;  %vm162_vm4 = vcmp.eq.s32.totalorder %v721_v44, %v110_v11 }
  0x8e   :  { %vm167_vm11 = vcmp.eq.s32.totalorder %v721_v44, %v125_v0  ;;  %vm143_vm12 = vcmp.eq.s32.totalorder %v721_v44, %v53_v1  ;;  %v512_v22 = vsel %vm162_vm4, 1.0, %v585_v48 }
  0x8f   :  { %v517_v3 = vsel %vm167_vm11, 1.0, %v585_v48  ;;  %v493_v4 = vsel %vm143_vm12, 1.0, %v585_v48 }
  0x90   :  { %525 = vmatmul.msk.f32.gmra.mxu0 %vm245_vm0, %v493_v4  ;;  %533 = vmatmul.msk.f32.gmra.mxu1 %vm245_vm0, %v501_v2 }
  0x91   :  { %549 = vmatmul.msk.f32.gmra.mxu3 %vm245_vm0, %v517_v3 }
  0x94   :  { %v86_v19 = vpop.permute.xlu2 %85 }
  0x95   :  { %v104_v6 = vpop.permute.xlu0 %103  ;;  %v128_v7 = vpop.permute.xlu1 %127  ;;  %vm154_vm7 = vcmp.eq.s32.totalorder %v721_v44, %v86_v19 }
  0x96   :  { %vm160_vm14 = vcmp.eq.s32.totalorder %v721_v44, %v104_v6  ;;  %vm168_vm15 = vcmp.eq.s32.totalorder %v721_v44, %v128_v7  ;;  %v504_v25 = vsel %vm154_vm7, 1.0, %v585_v48 }
  0x97   :  { %v510_v9 = vsel %vm160_vm14, 1.0, %v585_v48  ;;  %v518_v10 = vsel %vm168_vm15, 1.0, %v585_v48 }
  0x98   :  { %526 = vmatmul.msk.f32.gmra.mxu0 %vm245_vm0, %v494_v8  ;;  %542 = vmatmul.msk.f32.gmra.mxu2 %vm245_vm0, %v510_v9 }
  0x99   :  { %550 = vmatmul.msk.f32.gmra.mxu3 %vm245_vm0, %v518_v10 }
  0x9c   :  { %v65_v28 = vpop.permute.xlu2 %64 }
  0x9d   :  { %v80_v12 = vpop.permute.xlu0 %79  ;;  %v107_v13 = vpop.permute.xlu1 %106  ;;  %vm147_vm10 = vcmp.eq.s32.totalorder %v721_v44, %v65_v28 }
  0x9e   :  { %vm152_vm2 = vcmp.eq.s32.totalorder %v721_v44, %v80_v12  ;;  %vm161_vm3 = vcmp.eq.s32.totalorder %v721_v44, %v107_v13  ;;  %v497_v31 = vsel %vm147_vm10, 1.0, %v585_v48 }
  0x9f   :  { %v502_v14 = vsel %vm152_vm2, 1.0, %v585_v48  ;;  %v511_v15 = vsel %vm161_vm3, 1.0, %v585_v48 }
  0xa0   :  { %534 = vmatmul.msk.f32.gmra.mxu1 %vm245_vm0, %v502_v14  ;;  %543 = vmatmul.msk.f32.gmra.mxu2 %vm245_vm0, %v511_v15 }
  0xa1   :  { %551 = vmatmul.msk.f32.gmra.mxu3 %vm245_vm0, %v519_v16 }
  0xa4   :  { %v140_v34 = vpop.permute.xlu2 %139 }
  0xa5   :  { %v59_v17 = vpop.permute.xlu0 %58  ;;  %v83_v18 = vpop.permute.xlu1 %82  ;;  %vm172_vm13 = vcmp.eq.s32.totalorder %v721_v44, %v140_v34 }
  0xa6   :  { %vm145_vm5 = vcmp.eq.s32.totalorder %v721_v44, %v59_v17  ;;  %vm153_vm6 = vcmp.eq.s32.totalorder %v721_v44, %v83_v18  ;;  %v522_v39 = vsel %vm172_vm13, 1.0, %v585_v48 }
  0xa7   :  { %v495_v20 = vsel %vm145_vm5, 1.0, %v585_v48  ;;  %v503_v21 = vsel %vm153_vm6, 1.0, %v585_v48 }
  0xa8   :  { %527 = vmatmul.msk.f32.gmra.mxu0 %vm245_vm0, %v495_v20  ;;  %535 = vmatmul.msk.f32.gmra.mxu1 %vm245_vm0, %v503_v21 }
  0xa9   :  { %544 = vmatmul.msk.f32.gmra.mxu2 %vm245_vm0, %v512_v22 }
  0xad   :  { %v134_v23 = vpop.permute.xlu0 %133  ;;  %v62_v24 = vpop.permute.xlu1 %61 }
  0xae   :  { %vm170_vm8 = vcmp.eq.s32.totalorder %v721_v44, %v134_v23  ;;  %vm146_vm9 = vcmp.eq.s32.totalorder %v721_v44, %v62_v24 }
  0xaf   :  { %v520_v26 = vsel %vm170_vm8, 1.0, %v585_v48  ;;  %v496_v27 = vsel %vm146_vm9, 1.0, %v585_v48 }
  0xb0   :  { %528 = vmatmul.msk.f32.gmra.mxu0 %vm245_vm0, %v496_v27  ;;  %536 = vmatmul.msk.f32.gmra.mxu1 %vm245_vm0, %v504_v25 }
  0xb1   :  { %552 = vmatmul.msk.f32.gmra.mxu3 %vm245_vm0, %v520_v26 }
  0xb5   :  { %v113_v29 = vpop.permute.xlu0 %112  ;;  %v137_v30 = vpop.permute.xlu1 %136 }
  0xb6   :  { %vm163_vm11 = vcmp.eq.s32.totalorder %v721_v44, %v113_v29  ;;  %vm171_vm12 = vcmp.eq.s32.totalorder %v721_v44, %v137_v30 }
  0xb7   :  { %v513_v32 = vsel %vm163_vm11, 1.0, %v585_v48  ;;  %v521_v33 = vsel %vm171_vm12, 1.0, %v585_v48 }
  0xb8   :  { %529 = vmatmul.msk.f32.gmra.mxu0 %vm245_vm0, %v497_v31  ;;  %545 = vmatmul.msk.f32.gmra.mxu2 %vm245_vm0, %v513_v32 }
  0xb9   :  { %553 = vmatmul.msk.f32.gmra.mxu3 %vm245_vm0, %v521_v33 }
  0xbd   :  { %v89_v35 = vpop.permute.xlu0 %88  ;;  %v116_v36 = vpop.permute.xlu1 %115 }
  0xbe   :  { %vm155_vm14 = vcmp.eq.s32.totalorder %v721_v44, %v89_v35  ;;  %vm164_vm15 = vcmp.eq.s32.totalorder %v721_v44, %v116_v36 }
  0xbf   :  { %v505_v37 = vsel %vm155_vm14, 1.0, %v585_v48  ;;  %v514_v38 = vsel %vm164_vm15, 1.0, %v585_v48 }
  0xc0   :  { %537 = vmatmul.msk.f32.gmra.mxu1 %vm245_vm0, %v505_v37  ;;  %546 = vmatmul.msk.f32.gmra.mxu2 %vm245_vm0, %v514_v38 }
  0xc1   :  { %554 = vmatmul.msk.f32.gmra.mxu3 %vm245_vm0, %v522_v39 }
  0xc5   :  { %v68_v40 = vpop.permute.xlu0 %67  ;;  %v92_v41 = vpop.permute.xlu1 %91 }
  0xc6   :  { %vm148_vm1 = vcmp.eq.s32.totalorder %v721_v44, %v68_v40  ;;  %vm156_vm2 = vcmp.eq.s32.totalorder %v721_v44, %v92_v41 }
  0xc7   :  { %v498_v42 = vsel %vm148_vm1, 1.0, %v585_v48  ;;  %v506_v43 = vsel %vm156_vm2, 1.0, %v585_v48 }
  0xc8   :  { %530 = vmatmul.msk.f32.gmra.mxu0 %vm245_vm0, %v498_v42  ;;  %538 = vmatmul.msk.f32.gmra.mxu1 %vm245_vm0, %v506_v43 }
  0xf5   :  { %v359_v45 = vpop.f32.mrf.mxu0 }
  0xf6   :  { %455 = vst [vmem:[%s917_s2] sm:$0xff] %v359_v45 }
  0xfb   :  { %v407_v46 = vpop.f32.mrf.mxu2 }
  0xfc   :  { %471 = vst [vmem:[%s917_s2 + $0x80] sm:$0xff] %v407_v46 }
  0xfd   :  { %v383_v47 = vpop.f32.mrf.mxu1 }
  0xfe   :  { %463 = vst [vmem:[%s917_s2 + $0x40] sm:$0xff] %v383_v47 }
 0x103   :  { %v410_v44 = vpop.f32.mrf.mxu2 }
 0x104   :  { %472 = vst [vmem:[%s917_s2 + $0x88] sm:$0xff] %v410_v44  ;;  %v431_v48 = vpop.f32.mrf.mxu3 }
 0x105   :  { %479 = vst [vmem:[%s917_s2 + $0xc0] sm:$0xff] %v431_v48  ;;  %v362_v49 = vpop.f32.mrf.mxu0  ;;  %v386_v50 = vpop.f32.mrf.mxu1 }
 0x106   :  { %456 = vst [vmem:[%s917_s2 + $0x8] sm:$0xff] %v362_v49 }
 0x107   :  { %464 = vst [vmem:[%s917_s2 + $0x48] sm:$0xff] %v386_v50 }
 0x10c   :  { %v413_v51 = vpop.f32.mrf.mxu2  ;;  %v434_v52 = vpop.f32.mrf.mxu3 }
 0x10d   :  { %473 = vst [vmem:[%s917_s2 + $0x90] sm:$0xff] %v413_v51  ;;  %v365_v53 = vpop.f32.mrf.mxu0  ;;  %v389_v54 = vpop.f32.mrf.mxu1 }
 0x10e   :  { %480 = vst [vmem:[%s917_s2 + $0xc8] sm:$0xff] %v434_v52 }
 0x10f   :  { %457 = vst [vmem:[%s917_s2 + $0x10] sm:$0xff] %v365_v53 }
 0x110   :  { %465 = vst [vmem:[%s917_s2 + $0x50] sm:$0xff] %v389_v54 }
 0x114   :  { %v437_v55 = vpop.f32.mrf.mxu3 }
 0x115   :  { %481 = vst [vmem:[%s917_s2 + $0xd0] sm:$0xff] %v437_v55  ;;  %v368_v56 = vpop.f32.mrf.mxu0 }
 0x116   :  { %458 = vst [vmem:[%s917_s2 + $0x18] sm:$0xff] %v368_v56 }
 0x11b   :  { %v416_v57 = vpop.f32.mrf.mxu2 }
 0x11c   :  { %474 = vst [vmem:[%s917_s2 + $0x98] sm:$0xff] %v416_v57  ;;  %v440_v58 = vpop.f32.mrf.mxu3 }
 0x11d   :  { %482 = vst [vmem:[%s917_s2 + $0xd8] sm:$0xff] %v440_v58  ;;  %v392_v59 = vpop.f32.mrf.mxu1 }
 0x11e   :  { %466 = vst [vmem:[%s917_s2 + $0x58] sm:$0xff] %v392_v59 }
 0x123   :  { %v419_v60 = vpop.f32.mrf.mxu2 }
 0x124   :  { %475 = vst [vmem:[%s917_s2 + $0xa0] sm:$0xff] %v419_v60  ;;  %v443_v61 = vpop.f32.mrf.mxu3 }
 0x125   :  { %483 = vst [vmem:[%s917_s2 + $0xe0] sm:$0xff] %v443_v61  ;;  %v371_v62 = vpop.f32.mrf.mxu0  ;;  %v395_v63 = vpop.f32.mrf.mxu1 }
 0x126   :  { %459 = vst [vmem:[%s917_s2 + $0x20] sm:$0xff] %v371_v62 }
 0x127   :  { %467 = vst [vmem:[%s917_s2 + $0x60] sm:$0xff] %v395_v63 }
 0x12c   :  { %v422_v0 = vpop.f32.mrf.mxu2 }
 0x12d   :  { %476 = vst [vmem:[%s917_s2 + $0xa8] sm:$0xff] %v422_v0  ;;  %v374_v1 = vpop.f32.mrf.mxu0  ;;  %v398_v2 = vpop.f32.mrf.mxu1 }
 0x12e   :  { %460 = vst [vmem:[%s917_s2 + $0x28] sm:$0xff] %v374_v1 }
 0x12f   :  { %468 = vst [vmem:[%s917_s2 + $0x68] sm:$0xff] %v398_v2 }
 0x134   :  { %v446_v3 = vpop.f32.mrf.mxu3 }
 0x135   :  { %484 = vst [vmem:[%s917_s2 + $0xe8] sm:$0xff] %v446_v3  ;;  %v377_v4 = vpop.f32.mrf.mxu0 }
 0x136   :  { %461 = vst [vmem:[%s917_s2 + $0x30] sm:$0xff] %v377_v4 }
 0x13b   :  { %v425_v5 = vpop.f32.mrf.mxu2 }
 0x13c   :  { %477 = vst [vmem:[%s917_s2 + $0xb0] sm:$0xff] %v425_v5  ;;  %v449_v6 = vpop.f32.mrf.mxu3 }
 0x13d   :  { %485 = vst [vmem:[%s917_s2 + $0xf0] sm:$0xff] %v449_v6  ;;  %v401_v7 = vpop.f32.mrf.mxu1 }
 0x13e   :  { %469 = vst [vmem:[%s917_s2 + $0x70] sm:$0xff] %v401_v7 }
 0x143   :  { %v428_v8 = vpop.f32.mrf.mxu2 }
 0x144   :  { %478 = vst [vmem:[%s917_s2 + $0xb8] sm:$0xff] %v428_v8  ;;  %v452_v9 = vpop.f32.mrf.mxu3 }
 0x145   :  { %486 = vst [vmem:[%s917_s2 + $0xf8] sm:$0xff] %v452_v9  ;;  %v380_v10 = vpop.f32.mrf.mxu0  ;;  %v404_v11 = vpop.f32.mrf.mxu1 }
 0x146   :  { %462 = vst [vmem:[%s917_s2 + $0x38] sm:$0xff] %v380_v10 }
 0x147   :  { %470 = vst [vmem:[%s917_s2 + $0x78] sm:$0xff] %v404_v11 }

</bundles_post_ra>
